<compile_context>
chip_gen: v5e
topology: v5e:2x2
jax: 0.10.0
libtpu: 0.0.40
codegen_flags: <defaults>
</compile_context>

<pallas_src>
import functools

import jax
import jax.numpy as jnp
from jax import lax
from jax.experimental import pallas as pl
from jax.experimental.pallas import tpu as pltpu

_LANES = 128
# Per-input block element budget (~4 MiB for f32). Working set per step:
# 2 inputs x 2 pipeline buffers + ~4 block-sized f32 temporaries ~= 32 MiB,
# comfortably under the 48 MiB scoped-VMEM limit requested below and under
# v7x's 64 MiB physical VMEM.
_MAX_BLOCK_ELEMS = 1 << 20


def _fold_to_lanes(v):
    """Reduce the last (lane) dim to 128 by pairwise halving.

    Slices are 128-aligned (tile_d is 128 * 2^k), so this is pure VPU adds on
    whole vregs -- no XLU, no relayout.
    """
    w = v.shape[-1]
    while w > _LANES:
        w //= 2
        v = v[:, :w] + v[:, w:]
    return v


def _dice_kernel(x_ref, t_ref, inter_ref, denom_ref, *, d, tile_d, d_per, split):
    """Grid = (split, N-blocks, D-blocks); the D (reduction) axis is last.

    inter_ref / denom_ref are (tile_n, 128) output blocks used as resident
    accumulators across the D axis.
    """
    s = pl.program_id(0)  # D-split ("core") axis
    j = pl.program_id(2)  # D reduction axis

    @pl.when(j == 0)
    def _():
        inter_ref[...] = jnp.zeros_like(inter_ref)
        denom_ref[...] = jnp.zeros_like(denom_ref)

    def _accum(x, t):
        # Lane-wide accumulation only; the cross-lane reduce happens in the
        # (tiny) JAX epilogue, once per sample.
        inter_ref[...] += _fold_to_lanes(x * t)
        denom_ref[...] += _fold_to_lanes(x + t)

    d_blocks = split * d_per

    if d % tile_d == 0:
        # No ragged tail: plain accumulation every step, mask never compiled.
        _accum(x_ref[...].astype(jnp.float32), t_ref[...].astype(jnp.float32))
    else:
        # Only the globally-last D block is ragged; mask only there.
        is_last = jnp.logical_and(s == split - 1, j == d_per - 1)

        @pl.when(jnp.logical_not(is_last))
        def _():
            _accum(x_ref[...].astype(jnp.float32),
                   t_ref[...].astype(jnp.float32))

        @pl.when(is_last)
        def _():
            rem = d - (d_blocks - 1) * tile_d  # static, 1 <= rem < tile_d
            col = lax.broadcasted_iota(jnp.int32, (1, tile_d), 1)
            valid = col < rem
            x = jnp.where(valid, x_ref[...].astype(jnp.float32), 0.0)
            t = jnp.where(valid, t_ref[...].astype(jnp.float32), 0.0)
            _accum(x, t)


def dice_loss(input_nchw, target_nchw):
    """Pallas implementation of DiceLoss.forward (returns a scalar f32)."""
    assert input_nchw.shape == target_nchw.shape
    n = input_nchw.shape[0]
    # Flatten exactly like torch .view(N, -1).
    x = input_nchw.reshape(n, -1)
    t = target_nchw.reshape(n, -1)
    d = x.shape[1]

    # --- tile selection -----------------------------------------------------
    itemsize = jnp.dtype(x.dtype).itemsize
    row_align = max(8, 32 // max(int(itemsize), 1))  # 8 f32 / 16 bf16 / 32 int8

    if n < row_align:
        tile_n = n  # block dim equal to the full array dim: always legal
    else:
        tile_n = row_align

    # tile_d = 128 * 2^k: the smallest power covering D, capped by the budget.
    max_tile_d = max(_LANES, _MAX_BLOCK_ELEMS // tile_n)
    tile_d = _LANES
    while tile_d < d and tile_d * 2 <= max_tile_d:
        tile_d *= 2

    # Spend leftover budget on more (sublane-aligned) rows per block.
    if n >= row_align:
        budget_rows = max(row_align,
                          ((_MAX_BLOCK_ELEMS // tile_d) // row_align) * row_align)
        need_rows = pl.cdiv(n, row_align) * row_align
        tile_n = min(budget_rows, need_rows)

    n_blocks = pl.cdiv(n, tile_n)
    d_blocks = pl.cdiv(d, tile_d)
    n_pad = n_blocks * tile_n

    # v7x megacore: if a single N block would leave one TensorCore idle, split
    # the D reduction in two across a leading parallel axis (no-op on 1-TC
    # chips; partials are combined in the epilogue).
    split = 2 if (n_blocks == 1 and d_blocks >= 2 and d_blocks % 2 == 0) else 1
    d_per = d_blocks // split

    kernel = functools.partial(_dice_kernel, d=d, tile_d=tile_d,
                               d_per=d_per, split=split)

    in_map = lambda s, i, j: (i, s * d_per + j)
    out_spec = pl.BlockSpec((None, tile_n, _LANES), lambda s, i, j: (s, i, 0))
    out_shape = jax.ShapeDtypeStruct((split, n_pad, _LANES), jnp.float32)

    inter_out, denom_out = pl.pallas_call(
        kernel,
        out_shape=(out_shape, out_shape),
        grid_spec=pltpu.PrefetchScalarGridSpec(
            num_scalar_prefetch=0,
            grid=(split, n_blocks, d_per),
            in_specs=[
                pl.BlockSpec((tile_n, tile_d), in_map),
                pl.BlockSpec((tile_n, tile_d), in_map),
            ],
            out_specs=[out_spec, out_spec],
        ),
        compiler_params=pltpu.CompilerParams(
            dimension_semantics=("parallel", "parallel", "arbitrary"),
            vmem_limit_bytes=48 * 1024 * 1024,
        ),
    )(x, t)

    # Tiny finalize in plain JAX: fold the split axis + 128 lanes, drop padded
    # rows (they may hold garbage read past the array edge), then
    # loss = 1 - sum(dice)/N.
    inter = jnp.sum(inter_out, axis=(0, 2))[:n]
    denom = jnp.sum(denom_out, axis=(0, 2))[:n]
    smooth = jnp.float32(1.0)
    dice = 2.0 * (inter + smooth) / (denom + smooth)
    return jnp.float32(1.0) - jnp.sum(dice) / jnp.float32(n)


def dice_loss_ref(input_nchw, target_nchw):
    """Pure-JAX reference mirroring the PyTorch module."""
    n = target_nchw.shape[0]
    smooth = 1.0
    xf = input_nchw.reshape(n, -1).astype(jnp.float32)
    tf = target_nchw.reshape(n, -1).astype(jnp.float32)
    inter = (xf * tf).sum(axis=1)
    loss = 2.0 * (inter + smooth) / (xf.sum(axis=1) + tf.sum(axis=1) + smooth)
    return 1.0 - loss.sum() / n


if __name__ == "__main__":
    key = jax.random.PRNGKey(0)
    k1, k2 = jax.random.split(key)
    # Small segmentation-style input: (N, C, H, W)
    x = jax.random.uniform(k1, (2, 4, 16, 16), dtype=jnp.float32)           # predictions
    y = (jax.random.uniform(k2, (2, 4, 16, 16)) > 0.5).astype(jnp.float32)  # targets

    out = jax.block_until_ready(dice_loss(x, y))
    ref = jax.block_until_ready(dice_loss_ref(x, y))

    assert jnp.allclose(out, ref, rtol=1e-5, atol=1e-5), (out, ref)
    print("KERNEL_OK")
</pallas_src>

<mosaic_0001>
module attributes {stable_mosaic.version = 11 : i64} {
  func.func @_dice_kernel(%arg0: i32, %arg1: i32, %arg2: i32, %arg3: memref<2x1024xf32, #tpu.memory_space<vmem>>, %arg4: memref<2x1024xf32, #tpu.memory_space<vmem>>, %arg5: memref<1x2x128xf32, #tpu.memory_space<vmem>>, %arg6: memref<1x2x128xf32, #tpu.memory_space<vmem>>) attributes {dimension_semantics = [#tpu.dimension_semantics<parallel>, #tpu.dimension_semantics<parallel>, #tpu.dimension_semantics<arbitrary>], iteration_bounds = array<i64: 1, 1, 1>, scalar_prefetch = 0 : i64, scratch_operands = 0 : i64, tpu.core_type = #tpu.core_type<tc>, window_params = [{transform_indices = @transform_0, window_bounds = array<i64: 2, 1024>}, {transform_indices = @transform_1, window_bounds = array<i64: 2, 1024>}, {transform_indices = @transform_2, window_bounds = array<i64: 1, 2, 128>}, {transform_indices = @transform_3, window_bounds = array<i64: 1, 2, 128>}]} {
    %c0_i32 = arith.constant 0 : i32
    %0 = arith.cmpi eq, %arg2, %c0_i32 : i32
    %1 = arith.extui %0 : i1 to i32
    %c0_i32_0 = arith.constant 0 : i32
    %2 = arith.cmpi ne, %1, %c0_i32_0 : i32
    scf.if %2 {
      %cst = arith.constant 0.000000e+00 : f32
      %37 = vector.broadcast %cst : f32 to vector<2x128xf32>
      %c0_16 = arith.constant 0 : index
      %c0_17 = arith.constant 0 : index
      %c0_18 = arith.constant 0 : index
      %38 = vector.load %arg5[%c0_16, %c0_17, %c0_18] : memref<1x2x128xf32, #tpu.memory_space<vmem>>, vector<1x2x128xf32>
      %39 = vector.shape_cast %38 : vector<1x2x128xf32> to vector<2x128xf32>
      %40 = vector.shape_cast %37 : vector<2x128xf32> to vector<1x2x128xf32>
      tpu.vector_store %arg5[%c0_16, %c0_17, %c0_18], %40 {strides = array<i32>} : memref<1x2x128xf32, #tpu.memory_space<vmem>>, vector<1x2x128xf32>,
      %cst_19 = arith.constant 0.000000e+00 : f32
      %41 = vector.broadcast %cst_19 : f32 to vector<2x128xf32>
      %c0_20 = arith.constant 0 : index
      %c0_21 = arith.constant 0 : index
      %c0_22 = arith.constant 0 : index
      %42 = vector.load %arg6[%c0_20, %c0_21, %c0_22] : memref<1x2x128xf32, #tpu.memory_space<vmem>>, vector<1x2x128xf32>
      %43 = vector.shape_cast %42 : vector<1x2x128xf32> to vector<2x128xf32>
      %44 = vector.shape_cast %41 : vector<2x128xf32> to vector<1x2x128xf32>
      tpu.vector_store %arg6[%c0_20, %c0_21, %c0_22], %44 {strides = array<i32>} : memref<1x2x128xf32, #tpu.memory_space<vmem>>, vector<1x2x128xf32>,
    } else {
    }
    %c0 = arith.constant 0 : index
    %c0_1 = arith.constant 0 : index
    %3 = vector.load %arg3[%c0, %c0_1] : memref<2x1024xf32, #tpu.memory_space<vmem>>, vector<2x1024xf32>
    %c0_2 = arith.constant 0 : index
    %c0_3 = arith.constant 0 : index
    %4 = vector.load %arg4[%c0_2, %c0_3] : memref<2x1024xf32, #tpu.memory_space<vmem>>, vector<2x1024xf32>
    %c0_4 = arith.constant 0 : index
    %c0_5 = arith.constant 0 : index
    %c0_6 = arith.constant 0 : index
    %5 = vector.load %arg5[%c0_4, %c0_5, %c0_6] : memref<1x2x128xf32, #tpu.memory_space<vmem>>, vector<1x2x128xf32>
    %6 = vector.shape_cast %5 : vector<1x2x128xf32> to vector<2x128xf32>
    %7 = arith.mulf %3, %4 : vector<2x1024xf32>
    %8 = vector.extract_strided_slice %7 {offsets = [0, 0], sizes = [2, 512], strides = [1, 1]} : vector<2x1024xf32> to vector<2x512xf32>
    %9 = vector.extract_strided_slice %7 {offsets = [0, 512], sizes = [2, 512], strides = [1, 1]} : vector<2x1024xf32> to vector<2x512xf32>
    %10 = arith.addf %8, %9 : vector<2x512xf32>
    %11 = vector.extract_strided_slice %10 {offsets = [0, 0], sizes = [2, 256], strides = [1, 1]} : vector<2x512xf32> to vector<2x256xf32>
    %12 = vector.extract_strided_slice %10 {offsets = [0, 256], sizes = [2, 256], strides = [1, 1]} : vector<2x512xf32> to vector<2x256xf32>
    %13 = arith.addf %11, %12 : vector<2x256xf32>
    %14 = vector.extract_strided_slice %13 {offsets = [0, 0], sizes = [2, 128], strides = [1, 1]} : vector<2x256xf32> to vector<2x128xf32>
    %15 = vector.extract_strided_slice %13 {offsets = [0, 128], sizes = [2, 128], strides = [1, 1]} : vector<2x256xf32> to vector<2x128xf32>
    %16 = arith.addf %14, %15 : vector<2x128xf32>
    %17 = arith.addf %6, %16 : vector<2x128xf32>
    %c0_7 = arith.constant 0 : index
    %c0_8 = arith.constant 0 : index
    %c0_9 = arith.constant 0 : index
    %18 = vector.load %arg5[%c0_7, %c0_8, %c0_9] : memref<1x2x128xf32, #tpu.memory_space<vmem>>, vector<1x2x128xf32>
    %19 = vector.shape_cast %18 : vector<1x2x128xf32> to vector<2x128xf32>
    %20 = vector.shape_cast %17 : vector<2x128xf32> to vector<1x2x128xf32>
    tpu.vector_store %arg5[%c0_7, %c0_8, %c0_9], %20 {strides = array<i32>} : memref<1x2x128xf32, #tpu.memory_space<vmem>>, vector<1x2x128xf32>,
    %c0_10 = arith.constant 0 : index
    %c0_11 = arith.constant 0 : index
    %c0_12 = arith.constant 0 : index
    %21 = vector.load %arg6[%c0_10, %c0_11, %c0_12] : memref<1x2x128xf32, #tpu.memory_space<vmem>>, vector<1x2x128xf32>
    %22 = vector.shape_cast %21 : vector<1x2x128xf32> to vector<2x128xf32>
    %23 = arith.addf %3, %4 : vector<2x1024xf32>
    %24 = vector.extract_strided_slice %23 {offsets = [0, 0], sizes = [2, 512], strides = [1, 1]} : vector<2x1024xf32> to vector<2x512xf32>
    %25 = vector.extract_strided_slice %23 {offsets = [0, 512], sizes = [2, 512], strides = [1, 1]} : vector<2x1024xf32> to vector<2x512xf32>
    %26 = arith.addf %24, %25 : vector<2x512xf32>
    %27 = vector.extract_strided_slice %26 {offsets = [0, 0], sizes = [2, 256], strides = [1, 1]} : vector<2x512xf32> to vector<2x256xf32>
    %28 = vector.extract_strided_slice %26 {offsets = [0, 256], sizes = [2, 256], strides = [1, 1]} : vector<2x512xf32> to vector<2x256xf32>
    %29 = arith.addf %27, %28 : vector<2x256xf32>
    %30 = vector.extract_strided_slice %29 {offsets = [0, 0], sizes = [2, 128], strides = [1, 1]} : vector<2x256xf32> to vector<2x128xf32>
    %31 = vector.extract_strided_slice %29 {offsets = [0, 128], sizes = [2, 128], strides = [1, 1]} : vector<2x256xf32> to vector<2x128xf32>
    %32 = arith.addf %30, %31 : vector<2x128xf32>
    %33 = arith.addf %22, %32 : vector<2x128xf32>
    %c0_13 = arith.constant 0 : index
    %c0_14 = arith.constant 0 : index
    %c0_15 = arith.constant 0 : index
    %34 = vector.load %arg6[%c0_13, %c0_14, %c0_15] : memref<1x2x128xf32, #tpu.memory_space<vmem>>, vector<1x2x128xf32>
    %35 = vector.shape_cast %34 : vector<1x2x128xf32> to vector<2x128xf32>
    %36 = vector.shape_cast %33 : vector<2x128xf32> to vector<1x2x128xf32>
    tpu.vector_store %arg6[%c0_13, %c0_14, %c0_15], %36 {strides = array<i32>} : memref<1x2x128xf32, #tpu.memory_space<vmem>>, vector<1x2x128xf32>,
    return
  }
  func.func @transform_0(%arg0: i32, %arg1: i32, %arg2: i32) -> (i32, i32) {
    %c1_i32 = arith.constant 1 : i32
    %0 = arith.muli %arg0, %c1_i32 : i32
    %1 = arith.addi %0, %arg2 : i32
    %c0_i32 = arith.constant 0 : i32
    return %arg1, %1 : i32, i32
  }
  func.func @transform_1(%arg0: i32, %arg1: i32, %arg2: i32) -> (i32, i32) {
    %c1_i32 = arith.constant 1 : i32
    %0 = arith.muli %arg0, %c1_i32 : i32
    %1 = arith.addi %0, %arg2 : i32
    %c0_i32 = arith.constant 0 : i32
    return %arg1, %1 : i32, i32
  }
  func.func @transform_2(%arg0: i32, %arg1: i32, %arg2: i32) -> (i32, i32, i32) {
    %c0_i32 = arith.constant 0 : i32
    %c0_i32_0 = arith.constant 0 : i32
    return %arg0, %arg1, %c0_i32 : i32, i32, i32
  }
  func.func @transform_3(%arg0: i32, %arg1: i32, %arg2: i32) -> (i32, i32, i32) {
    %c0_i32 = arith.constant 0 : i32
    %c0_i32_0 = arith.constant 0 : i32
    return %arg0, %arg1, %c0_i32 : i32, i32, i32
  }
}

</mosaic_0001>

<bundles_post_ra>
// kernel: tpu_custom_call.1
= control target key start
LH: loop header
LB: loop body
LE: loop exit
PB: predicated region body
PF: predicated region fallthrough
CT: control target
= control target key end

     0   :  { %9 = vsyncpa [#allocation3], 0  ;;  %s273_s0 = inlined_call_operand.hbm [shape: f32[2,1024], index: 0, kind: input, shape index: {}]   ;;  %s274_s1 = inlined_call_operand.hbm [shape: f32[2,1024], index: 1, kind: input, shape index: {}]   ;;  %s275_s2 = inlined_call_operand.hbm [shape: f32[1,2,128], index: 2, kind: output, shape index: {0}]   ;;  %s276_s3 = inlined_call_operand.hbm [shape: f32[1,2,128], index: 3, kind: output, shape index: {1}]  }
   0x1   :  { %10 = vsyncpa [#allocation6], 0 }
   0x2   :  { %11 = vsyncpa [#allocation4], 0 }
   0x3   :  { %12 = vsyncpa [#allocation9], 0  ;;  %s22_s14 = sshll.u32 %s273_s0, 4  ;;  %s236_s15 = smov [#allocation2]   ;;  %s23_s14 = int_to_ptr.hbm [resolvable:$true] %s22_s14 }
   0x4   :  { %s24_s16 = sshll.u32 %s236_s15, 4  ;;  %s37_s19 = sshll.u32 %s274_s1, 4  ;;  %s25_s16 = int_to_ptr.vmem [resolvable:$true] %s24_s16  ;;  %s38_s19 = int_to_ptr.hbm [resolvable:$true] %s37_s19 }
   0x5   :  { %27 = dma.hbm_to_vmem [thread:$0]  %s23_s14, 256, %s25_s16, [#allocation3]  }
   0x6   :  { %s237_s20 = smov [#allocation5]  }
   0x7   :  { %s39_s21 = sshll.u32 %s237_s20, 4  ;;  %s40_s21 = int_to_ptr.vmem [resolvable:$true] %s39_s21 }
   0x8   :  { %42 = dma.hbm_to_vmem [thread:$0]  %s38_s19, 256, %s40_s21, [#allocation6]  }
   0x9   :  { %228 = dma.done.wait [#allocation3], 256  }
   0xa   :  { %229 = vsyncadd [#allocation3], 4294967040 }
   0xb   :  { %230 = dma.done.wait [#allocation6], 256  }
   0xc   :  { %231 = vsyncadd [#allocation6], 4294967040  ;;  %v238_v0 = vmov 0.0   ;;  %v61_v1 = vld [vmem:[#allocation2] sm:$0xff]  ;;  %v62_v2 = vld [vmem:[#allocation2 + $0x8] sm:$0xff]  ;;  %s239_s0 = smov [#allocation7]  }
   0xd   :  { %59 = vst [vmem:[#allocation7] sm:$0x3] %v238_v0  ;;  %v63_v3 = vld [vmem:[#allocation5] sm:$0xff]  ;;  %v64_v4 = vld [vmem:[#allocation5 + $0x8] sm:$0xff]  ;;  %s98_s1 = sshll.u32 %s239_s0, 4  ;;  %s100_s24 = sshll.u32 %s275_s2, 4  ;;  %s99_s1 = int_to_ptr.vmem [resolvable:$true] %s98_s1  ;;  %s101_s24 = int_to_ptr.hbm [resolvable:$true] %s100_s24 }
   0xe   :  { %60 = vst [vmem:[#allocation8] sm:$0x3] %v238_v0  ;;  %v66_v5 = vmul.f32 %v63_v3, %v61_v1  ;;  %v80_v6 = vadd.f32 %v63_v3, %v61_v1  ;;  %v67_v7 = vmul.f32 %v64_v4, %v62_v2  ;;  %v81_v8 = vadd.f32 %v64_v4, %v62_v2  ;;  %s240_s25 = smov [#allocation8]   ;;  %s111_s29 = sshll.u32 %s276_s3, 4  ;;  %s112_s29 = int_to_ptr.hbm [resolvable:$true] %s111_s29 }
   0xf   :  { %s109_s26 = sshll.u32 %s240_s25, 4  ;;  %s110_s26 = int_to_ptr.vmem [resolvable:$true] %s109_s26 }
  0x10   :  { %v68_v9 = vadd.f32 %v67_v7, %v66_v5  ;;  %v82_v10 = vadd.f32 %v81_v8, %v80_v6 }
  0x12   :  { %v70_v11 = vrot.slane %v68_v9, 4  ;;  %v84_v12 = vrot.slane %v82_v10, 4 }
  0x14   :  { %v72_v13 = vadd.f32 %v70_v11, %v68_v9  ;;  %v86_v14 = vadd.f32 %v84_v12, %v82_v10  ;;  %v65_v17 = vld [vmem:[#allocation7] sm:$0x3] }
  0x15   :  { %v79_v18 = vld [vmem:[#allocation8] sm:$0x3] }
  0x16   :  { %v74_v15 = vrot.slane %v72_v13, 2  ;;  %v88_v16 = vrot.slane %v86_v14, 2 }
  0x18   :  { %v76_v19 = vadd.f32 %v74_v15, %v72_v13  ;;  %v90_v20 = vadd.f32 %v88_v16, %v86_v14 }
  0x1a   :  { %v77_v21 = vadd.f32 %v76_v19, %v65_v17  ;;  %v91_v22 = vadd.f32 %v90_v20, %v79_v18 }
  0x1c   :  { %78 = vst [vmem:[#allocation7] sm:$0x3] %v77_v21 }
  0x1d   :  { %92 = vst [vmem:[#allocation8] sm:$0x3] %v91_v22  ;;  %103 = dma.vmem_to_hbm [thread:$0]  %s99_s1, 32, %s101_s24, [#allocation4]  }
  0x1e   :  { %114 = dma.vmem_to_hbm [thread:$0]  %s110_s26, 32, %s112_s29, [#allocation9]  }
  0x1f   :  { %232 = dma.done.wait [#allocation4], 32  }
  0x20   :  { %233 = vsyncadd [#allocation4], 4294967264 }
  0x21   :  { %234 = dma.done.wait [#allocation9], 32  }
  0x22   :  { %235 = vsyncadd [#allocation9], 4294967264 }
  0x23   :  { %123 = vsyncpa [#allocation3], 1 }
  0x24   :  { %124 = vsyncpa [#allocation6], 1 }
  0x25   :  { %125 = vsyncpa [#allocation4], 1 }
  0x26   :  { %126 = vsyncpa [#allocation9], 1 }

</bundles_post_ra>
